<compile_context>
chip_gen: v7x
topology: tpu7x:2x2x1
jax: 0.10.0
libtpu: 0.0.40
codegen_flags: <defaults>
</compile_context>

<pallas_src>
import numpy as np
import jax
import jax.numpy as jnp
from jax.experimental import pallas as pl
from jax.experimental.pallas import tpu as pltpu

_LANES = 128
_SUBLANES = 8
_MAX_CHUNKS = 128          # bound on the statically-unrolled per-chunk loop


def _sumsq_kernel(z_ref, acc_ref):
    """Accumulate per-sample, per-lane partial sums of z**2.

    z_ref:   (tb, td) input tile in native dtype (td a multiple of 128)
    acc_ref: (tb, 128) f32 output block; same block across the D (reduction)
             grid axis, so it acts as a VMEM-resident accumulator.
    """
    @pl.when(pl.program_id(1) == 0)
    def _():
        acc_ref[...] = jnp.zeros_like(acc_ref)

    td = z_ref.shape[1]
    acc = acc_ref[...]
    # Per-128-lane chunk: load -> upcast -> square -> accumulate.  Keeps the
    # live set small (acc vregs + a few in-flight chunk vregs), no full-tile
    # f32 temporaries, pure VPU MACs easily hidden under the input DMA.
    for c in range(td // _LANES):
        x = z_ref[:, c * _LANES:(c + 1) * _LANES].astype(jnp.float32)
        acc = acc + x * x
    acc_ref[...] = acc


def _largest_aligned_divisor(n, align, cap):
    """Largest multiple of `align` that divides `n` and is <= cap (>= align)."""
    cap = max(align, min(cap, n))
    best = align
    t = align
    while t <= cap:
        if n % t == 0:
            best = t
        t += align
    return best


def _device_config():
    """(max_block_bytes, vmem_limit_bytes, want_parallel_split) per TPU gen."""
    try:
        kind = jax.devices()[0].device_kind.lower()
    except Exception:
        kind = ""
    if "v7" in kind:
        # 2 TCs, ~3.2 TB/s, 64 MiB VMEM: big blocks + split the parallel axis.
        return 8 << 20, 48 << 20, True
    if "v6" in kind:
        return 4 << 20, None, False
    if "v5" in kind:
        return 2 << 20, None, False
    # Unknown / future generation: moderate blocks, assume multiple cores.
    return 4 << 20, None, True


def flow_loss(z, sldj, k=256):
    """NLL of a RealNVP model with a standard-Normal prior.

    z:    (B, ...) latent (any float dtype; kept native, accumulated in f32)
    sldj: (B,)     sum of log-determinants of Jacobians
    returns scalar float32 nll
    """
    B = z.shape[0]
    z_flat = z.reshape(B, -1)                    # native dtype, no wrapper cast
    D = z_flat.shape[1]

    max_block_bytes, vmem_limit, want_split = _device_config()
    itemsize = jnp.dtype(z_flat.dtype).itemsize

    # Pad features to a multiple of 128 and batch to a multiple of 8; zero
    # rows/cols contribute 0 to sum(z^2) and padded rows are sliced off below.
    Dp = -(-D // _LANES) * _LANES
    Bp = -(-B // _SUBLANES) * _SUBLANES
    if (Dp != D) or (Bp != B):
        z_flat = jnp.pad(z_flat, ((0, Bp - B), (0, Dp - D)))

    # Batch tile: multiple of 8 dividing Bp.  On 2-TC parts keep >= 2 blocks
    # on the "parallel" axis so both TensorCores get work.
    tb_cap = 256
    if want_split and Bp >= 2 * _SUBLANES:
        tb_cap = min(tb_cap, Bp // 2)
    tb = _largest_aligned_divisor(Bp, _SUBLANES, tb_cap)

    # Feature tile: largest 128-multiple divisor of Dp within the per-block
    # byte budget, capped so the in-kernel chunk loop stays short.
    td_cap = max(_LANES, min(max_block_bytes // max(1, tb * itemsize),
                             _MAX_CHUNKS * _LANES))
    td = _largest_aligned_divisor(Dp, _LANES, td_cap)

    grid = (Bp // tb, Dp // td)                  # reduction axis last

    per_lane = pl.pallas_call(
        _sumsq_kernel,
        out_shape=jax.ShapeDtypeStruct((Bp, _LANES), jnp.float32),
        grid=grid,
        in_specs=[pl.BlockSpec((tb, td), lambda i, j: (i, j))],
        out_specs=pl.BlockSpec((tb, _LANES), lambda i, j: (i, 0)),
        compiler_params=pltpu.CompilerParams(
            dimension_semantics=("parallel", "arbitrary"),
            vmem_limit_bytes=vmem_limit),
    )(z_flat)

    # Scalar / B-length epilogue in plain JAX (free compared to the streaming).
    sumsq = jnp.sum(per_lane[:B], axis=-1)                    # (B,)
    log_2pi = float(np.log(2.0 * np.pi))
    log_k = float(np.log(float(k)))
    prior_ll = -0.5 * sumsq - 0.5 * float(D) * log_2pi        # standard Normal
    corrected_prior_ll = prior_ll - log_k * float(D)
    ll = corrected_prior_ll + sldj.astype(jnp.float32)
    return -jnp.mean(ll)


def flow_loss_ref(z, sldj, k=256):
    """Pure-JAX reference (same math) for sanity checking."""
    B = z.shape[0]
    zf = z.reshape(B, -1).astype(jnp.float32)
    D = zf.shape[1]
    prior_ll = -0.5 * jnp.sum(zf * zf, axis=1) - 0.5 * D * np.log(2.0 * np.pi)
    corrected = prior_ll - np.log(float(k)) * D
    ll = corrected + sldj.astype(jnp.float32)
    return -jnp.mean(ll)


if __name__ == "__main__":
    key = jax.random.PRNGKey(0)
    kz, ks, kz2, ks2, kz3, ks3 = jax.random.split(key, 6)

    # Case 1: image-shaped latent, NCHW, aligned D (= 1024), f32.
    B, C, H, W = 2, 4, 16, 16
    z = jax.random.normal(kz, (B, C, H, W), dtype=jnp.float32)
    sldj = jax.random.normal(ks, (B,), dtype=jnp.float32)
    nll = flow_loss(z, sldj, k=256)
    jax.block_until_ready(nll)
    nll_ref = flow_loss_ref(z, sldj, k=256)
    assert jnp.allclose(nll, nll_ref, rtol=1e-5, atol=1e-4), (nll, nll_ref)

    # Case 2: odd feature size (lane padding) + bf16 latent (native-dtype input
    # with in-kernel f32 accumulation).
    B2 = 2
    z2 = jax.random.normal(kz2, (B2, 5, 7, 9), dtype=jnp.float32).astype(jnp.bfloat16)
    sldj2 = jax.random.normal(ks2, (B2,), dtype=jnp.float32)
    nll2 = flow_loss(z2, sldj2, k=256)
    jax.block_until_ready(nll2)
    nll2_ref = flow_loss_ref(z2, sldj2, k=256)
    assert jnp.allclose(nll2, nll2_ref, rtol=1e-4, atol=1e-3), (nll2, nll2_ref)

    # Case 3: batch not a multiple of 8 (exercises B padding + slicing) and a
    # non-power-of-two D (exercises largest-divisor feature tiling).
    B3 = 10
    z3 = jax.random.normal(kz3, (B3, 3, 16, 16), dtype=jnp.float32)
    sldj3 = jax.random.normal(ks3, (B3,), dtype=jnp.float32)
    nll3 = flow_loss(z3, sldj3, k=256)
    jax.block_until_ready(nll3)
    nll3_ref = flow_loss_ref(z3, sldj3, k=256)
    assert jnp.allclose(nll3, nll3_ref, rtol=2e-5, atol=1e-3), (nll3, nll3_ref)

    print("KERNEL_OK")
</pallas_src>

<mosaic_0001>
module attributes {stable_mosaic.version = 11 : i64} {
  func.func @_sumsq_kernel(%arg0: i32, %arg1: i32, %arg2: memref<8x1024xf32, #tpu.memory_space<vmem>>, %arg3: memref<8x128xf32, #tpu.memory_space<vmem>>) attributes {dimension_semantics = [#tpu.dimension_semantics<parallel>, #tpu.dimension_semantics<arbitrary>], iteration_bounds = array<i64: 1, 1>, scalar_prefetch = 0 : i64, scratch_operands = 0 : i64, tpu.core_type = #tpu.core_type<tc>, window_params = [{transform_indices = @transform_0, window_bounds = array<i64: 8, 1024>}, {transform_indices = @transform_1, window_bounds = array<i64: 8, 128>}]} {
    %c0_i32 = arith.constant 0 : i32
    %0 = arith.cmpi eq, %arg1, %c0_i32 : i32
    %1 = arith.extui %0 : i1 to i32
    %c0_i32_0 = arith.constant 0 : i32
    %2 = arith.cmpi ne, %1, %c0_i32_0 : i32
    scf.if %2 {
      %cst = arith.constant 0.000000e+00 : f32
      %29 = vector.broadcast %cst : f32 to vector<8x128xf32>
      %c0_13 = arith.constant 0 : index
      %c0_14 = arith.constant 0 : index
      %30 = vector.load %arg3[%c0_13, %c0_14] : memref<8x128xf32, #tpu.memory_space<vmem>>, vector<8x128xf32>
      tpu.vector_store %arg3[%c0_13, %c0_14], %29 {strides = array<i32>} : memref<8x128xf32, #tpu.memory_space<vmem>>, vector<8x128xf32>,
    } else {
    }
    %c0 = arith.constant 0 : index
    %c0_1 = arith.constant 0 : index
    %3 = vector.load %arg3[%c0, %c0_1] : memref<8x128xf32, #tpu.memory_space<vmem>>, vector<8x128xf32>
    %c0_2 = arith.constant 0 : index
    %c0_3 = arith.constant 0 : index
    %4 = vector.load %arg2[%c0_2, %c0_3] : memref<8x1024xf32, #tpu.memory_space<vmem>>, vector<8x128xf32>
    %5 = arith.mulf %4, %4 : vector<8x128xf32>
    %6 = arith.addf %3, %5 : vector<8x128xf32>
    %c0_4 = arith.constant 0 : index
    %c128 = arith.constant 128 : index
    %7 = vector.load %arg2[%c0_4, %c128] : memref<8x1024xf32, #tpu.memory_space<vmem>>, vector<8x128xf32>
    %8 = arith.mulf %7, %7 : vector<8x128xf32>
    %9 = arith.addf %6, %8 : vector<8x128xf32>
    %c0_5 = arith.constant 0 : index
    %c256 = arith.constant 256 : index
    %10 = vector.load %arg2[%c0_5, %c256] : memref<8x1024xf32, #tpu.memory_space<vmem>>, vector<8x128xf32>
    %11 = arith.mulf %10, %10 : vector<8x128xf32>
    %12 = arith.addf %9, %11 : vector<8x128xf32>
    %c0_6 = arith.constant 0 : index
    %c384 = arith.constant 384 : index
    %13 = vector.load %arg2[%c0_6, %c384] : memref<8x1024xf32, #tpu.memory_space<vmem>>, vector<8x128xf32>
    %14 = arith.mulf %13, %13 : vector<8x128xf32>
    %15 = arith.addf %12, %14 : vector<8x128xf32>
    %c0_7 = arith.constant 0 : index
    %c512 = arith.constant 512 : index
    %16 = vector.load %arg2[%c0_7, %c512] : memref<8x1024xf32, #tpu.memory_space<vmem>>, vector<8x128xf32>
    %17 = arith.mulf %16, %16 : vector<8x128xf32>
    %18 = arith.addf %15, %17 : vector<8x128xf32>
    %c0_8 = arith.constant 0 : index
    %c640 = arith.constant 640 : index
    %19 = vector.load %arg2[%c0_8, %c640] : memref<8x1024xf32, #tpu.memory_space<vmem>>, vector<8x128xf32>
    %20 = arith.mulf %19, %19 : vector<8x128xf32>
    %21 = arith.addf %18, %20 : vector<8x128xf32>
    %c0_9 = arith.constant 0 : index
    %c768 = arith.constant 768 : index
    %22 = vector.load %arg2[%c0_9, %c768] : memref<8x1024xf32, #tpu.memory_space<vmem>>, vector<8x128xf32>
    %23 = arith.mulf %22, %22 : vector<8x128xf32>
    %24 = arith.addf %21, %23 : vector<8x128xf32>
    %c0_10 = arith.constant 0 : index
    %c896 = arith.constant 896 : index
    %25 = vector.load %arg2[%c0_10, %c896] : memref<8x1024xf32, #tpu.memory_space<vmem>>, vector<8x128xf32>
    %26 = arith.mulf %25, %25 : vector<8x128xf32>
    %27 = arith.addf %24, %26 : vector<8x128xf32>
    %c0_11 = arith.constant 0 : index
    %c0_12 = arith.constant 0 : index
    %28 = vector.load %arg3[%c0_11, %c0_12] : memref<8x128xf32, #tpu.memory_space<vmem>>, vector<8x128xf32>
    tpu.vector_store %arg3[%c0_11, %c0_12], %27 {strides = array<i32>} : memref<8x128xf32, #tpu.memory_space<vmem>>, vector<8x128xf32>,
    return
  }
  func.func @transform_0(%arg0: i32, %arg1: i32) -> (i32, i32) {
    %c0_i32 = arith.constant 0 : i32
    return %arg0, %arg1 : i32, i32
  }
  func.func @transform_1(%arg0: i32, %arg1: i32) -> (i32, i32) {
    %c0_i32 = arith.constant 0 : i32
    %c0_i32_0 = arith.constant 0 : i32
    return %arg0, %c0_i32 : i32, i32
  }
}

</mosaic_0001>

<bundles_post_ra>
// kernel: tpu_custom_call.1
= control target key start
LH: loop header
LB: loop body
LE: loop exit
PB: predicated region body
PF: predicated region fallthrough
CT: control target
= control target key end

     0   :  { %6 = vsyncpa [#allocation3], 0  ;;  %s154_s0 = inlined_call_operand.hbm [shape: f32[8,1024], index: 0, kind: input, shape index: {}]   ;;  %s155_s1 = inlined_call_operand.hbm [shape: f32[8,128], index: 1, kind: output, shape index: {}]  }
   0x1   :  { %7 = vsyncpa [#allocation4], 0  ;;  %s118_s6 = smov [#allocation2]   ;;  %s70_s10 = scalar_lea.hbm %s154_s0, 1024 }
   0x2   :  { %s14_s7 = sshll.u32 %s118_s6, 4  ;;  %p71_p0 = scmp.ne.s32.totalorder %s154_s0, %s70_s10  ;;  %s15_s7 = int_to_ptr.vmem [resolvable:$true] %s14_s7 }
   0x3   :  { %p74_p1 = scmp.lt.u32.totalorder %s70_s10, %s154_s0 }
   0x5   :  { %p76_p2 = pnand %p74_p1, %p71_p0 }
   0x7   :  { %79 = shalt.err (!%p76_p2)
}
   0x8   :  { %s80_s15 = scalar_lea.vmem %s15_s7, 1024  ;;  %p85_p4 = scmp.lt.s32.totalorder %s15_s7, %s15_s7 }
   0x9   :  { %p81_p3 = scmp.ne.s32.totalorder %s15_s7, %s80_s15  ;;  %p86_p5 = scmp.lt.s32.totalorder %s80_s15, %s80_s15 }
   0xb   :  { %p87_p6 = por %p86_p5, %p85_p4 }
   0xd   :  { %p88_p7 = pnand %p87_p6, %p81_p3 }
   0xf   :  { %91 = shalt.err (!%p88_p7)
}
  0x10   :  { %17 = dma.hbm_to_vmem [thread:$0]  %s154_s0, 1024, %s15_s7, [#allocation3]  }
  0x11   :  { %114 = dma.done.wait [#allocation3], 1024  }
  0x12   :  { %115 = vsyncadd [#allocation3], 4294966272  ;;  %v27_v0 = vld [vmem:[#allocation2] sm:$0xff]  ;;  %v30_v1 = vld [vmem:[#allocation2 + $0x8] sm:$0xff]  ;;  %s119_s0 = smov [#allocation5]  }
  0x13   :  { %v33_v2 = vld [vmem:[#allocation2 + $0x10] sm:$0xff]  ;;  %v28_v3 = vmul.f32 %v27_v0, %v27_v0  ;;  %v31_v4 = vmul.f32 %v30_v1, %v30_v1  ;;  %v36_v5 = vld [vmem:[#allocation2 + $0x18] sm:$0xff]  ;;  %v39_v7 = vld [vmem:[#allocation2 + $0x20] sm:$0xff]  ;;  %s58_s18 = sshll.u32 %s119_s0, 4  ;;  %s59_s18 = int_to_ptr.vmem [resolvable:$true] %s58_s18 }
  0x14   :  { %v34_v6 = vmul.f32 %v33_v2, %v33_v2  ;;  %v37_v9 = vmul.f32 %v36_v5, %v36_v5  ;;  %v42_v10 = vld [vmem:[#allocation2 + $0x28] sm:$0xff]  ;;  %v40_v12 = vmul.f32 %v39_v7, %v39_v7  ;;  %v45_v13 = vld [vmem:[#allocation2 + $0x30] sm:$0xff]  ;;  %v48_v16 = vld [vmem:[#allocation2 + $0x38] sm:$0xff]  ;;  %s92_s19 = scalar_lea.vmem %s59_s18, 128  ;;  %p97_p9 = scmp.lt.s32.totalorder %s59_s18, %s59_s18 }
  0x15   :  { %v32_v8 = vadd.f32 %v31_v4, %v28_v3  ;;  %v43_v15 = vmul.f32 %v42_v10, %v42_v10  ;;  %v46_v18 = vmul.f32 %v45_v13, %v45_v13  ;;  %v49_v20 = vmul.f32 %v48_v16, %v48_v16  ;;  %p93_p8 = scmp.ne.s32.totalorder %s59_s18, %s92_s19  ;;  %p98_p10 = scmp.lt.s32.totalorder %s92_s19, %s92_s19 }
  0x17   :  { %v35_v11 = vadd.f32 %v34_v6, %v32_v8  ;;  %p99_p11 = por %p98_p10, %p97_p9 }
  0x19   :  { %v38_v14 = vadd.f32 %v37_v9, %v35_v11  ;;  %p100_p12 = pnand %p99_p11, %p93_p8 }
  0x1b   :  { %v41_v17 = vadd.f32 %v40_v12, %v38_v14 }
  0x1d   :  { %v44_v19 = vadd.f32 %v43_v15, %v41_v17 }
  0x1f   :  { %v47_v21 = vadd.f32 %v46_v18, %v44_v19 }
  0x21   :  { %v50_v22 = vadd.f32 %v49_v20, %v47_v21 }
  0x23   :  { %51 = vst [vmem:[#allocation5] sm:$0xff] %v50_v22 }
  0x24   :  { %103 = shalt.err (!%p100_p12)
}
  0x25   :  { %s104_s22 = scalar_lea.hbm %s155_s1, 128 }
  0x26   :  { %p105_p13 = scmp.ne.s32.totalorder %s155_s1, %s104_s22  ;;  %p108_p0 = scmp.lt.u32.totalorder %s104_s22, %s155_s1 }
  0x28   :  { %p110_p1 = pnand %p108_p0, %p105_p13 }
  0x2a   :  { %113 = shalt.err (!%p110_p1)
}
  0x2b   :  { %61 = dma.vmem_to_hbm [thread:$0]  %s59_s18, 128, %s155_s1, [#allocation4]  }
  0x2c   :  { %116 = dma.done.wait [#allocation4], 128  }
  0x2d   :  { %117 = vsyncadd [#allocation4], 4294967168 }
  0x2e   :  { %65 = vsyncpa [#allocation3], 1 }
  0x2f   :  { %66 = vsyncpa [#allocation4], 1 }

</bundles_post_ra>
